<compile_context>
chip_gen: v6e
topology: v6e:2x2x1
jax: 0.10.0
libtpu: 0.0.40
codegen_flags: <defaults>
</compile_context>

<pallas_src>
import numpy as np
import jax
import jax.numpy as jnp
from jax import lax
from jax.experimental import pallas as pl
from jax.experimental.pallas import tpu as pltpu

EMBED_DIM = 32
NUM_HEADS = 4
N_ROWS = 16          # "batch" rows (become the MHA batch axis after unsqueeze(0))
LN_EPS = 1e-5
INV_SQRT2 = 1.0 / np.sqrt(2.0)

# Packed parameter slab layout (rows).
_ROW_B_ATTN = 0                       # fused attention bias        (1, E)
_ROW_GAMMA = 1                        # LayerNorm gamma             (1, E)
_ROW_BETA = 2                         # LayerNorm beta              (1, E)
_ROW_B_FC = 3                         # fc bias                     (1, E)
_ROW_W_ATTN = 8                       # fused attn weight           (E, E)  8-aligned
_ROW_W_FC = 8 + EMBED_DIM             # fc weight                   (E, E)  8-aligned
_SLAB_ROWS = 8 + 2 * EMBED_DIM


def cross_attention_kernel(q_ref, v_ref, slab_ref, o_ref):
    q = q_ref[...]                                           # (N, E) residual path
    v = v_ref[...]                                           # (N, E)

    b_attn = slab_ref[_ROW_B_ATTN:_ROW_B_ATTN + 1, :]        # (1, E)
    gamma = slab_ref[_ROW_GAMMA:_ROW_GAMMA + 1, :]
    beta = slab_ref[_ROW_BETA:_ROW_BETA + 1, :]
    b_fc = slab_ref[_ROW_B_FC:_ROW_B_FC + 1, :]
    w_attn = slab_ref[_ROW_W_ATTN:_ROW_W_ATTN + EMBED_DIM, :]   # (E, E)
    w_fc = slab_ref[_ROW_W_FC:_ROW_W_FC + EMBED_DIM, :]         # (E, E)

    # Fused V-projection + out-projection (softmax over the single key == 1.0,
    # so the attention context equals the V-projection exactly).
    attn = jnp.dot(v, w_attn, preferred_element_type=jnp.float32) + b_attn

    # Residual + LayerNorm over the embedding axis.
    x = q + attn
    mu = jnp.mean(x, axis=-1, keepdims=True)
    var = jnp.mean((x - mu) * (x - mu), axis=-1, keepdims=True)
    y = (x - mu) * lax.rsqrt(var + LN_EPS) * gamma + beta

    # Exact (erf-based) GELU, then the fc Linear.  Dropout is identity in eval mode.
    g = 0.5 * y * (1.0 + lax.erf(y * INV_SQRT2))
    out = jnp.dot(g, w_fc, preferred_element_type=jnp.float32) + b_fc

    o_ref[...] = out.astype(o_ref.dtype)


def cross_attention_forward(query, key, value, params):
    """Forward pass matching CrossAttention.forward in eval mode.

    `key` is accepted to preserve the module interface but is mathematically
    unused: after unsqueeze(0) the key sequence length is exactly 1 (and no
    attn_mask / key_padding_mask is applied), so the softmax over the key axis
    is identically 1.0 and the Q/K projections cancel out of the forward value.
    This shortcut is ONLY valid for that single-key case.
    """
    N, E = query.shape
    assert E == EMBED_DIM
    assert key.shape == value.shape == (N, E)

    f32 = jnp.float32
    hi = lax.Precision.HIGHEST

    # Trace-time fusion of the V-projection and out-projection:
    #   attn = (v @ Wv.T + bv) @ Wo.T + bo = v @ (Wv.T @ Wo.T) + (bv @ Wo.T + bo)
    w_attn = jnp.dot(params["Wv"].T, params["Wo"].T, precision=hi)           # (E, E)
    b_attn = jnp.dot(params["bv"], params["Wo"].T, precision=hi) + params["bo"]
    w_fc = params["Wfc"].T                                                    # (E, E)

    # Pack every parameter into ONE slab -> a single parameter DMA.
    vec_block = jnp.zeros((8, E), f32).at[:4].set(
        jnp.stack([b_attn.astype(f32), params["gamma"].astype(f32),
                   params["beta"].astype(f32), params["bfc"].astype(f32)]))
    slab = jnp.concatenate(
        [vec_block, w_attn.astype(f32), w_fc.astype(f32)], axis=0)            # (8+2E, E)

    vmem = pl.BlockSpec(memory_space=pltpu.MemorySpace.VMEM)  # full array, VMEM-resident

    return pl.pallas_call(
        cross_attention_kernel,
        out_shape=jax.ShapeDtypeStruct((N, E), f32),
        in_specs=[vmem, vmem, vmem],
        out_specs=vmem,
    )(query, value, slab)


def reference_forward(query, key, value, params):
    """Pure-JAX reference implementing the FULL MHA path (incl. Q/K + softmax)."""
    N, E = query.shape
    H, hd = NUM_HEADS, E // NUM_HEADS
    q = query @ params["Wq"].T + params["bq"]
    k = key @ params["Wk"].T + params["bk"]
    v = value @ params["Wv"].T + params["bv"]
    qh = q.reshape(N, H, hd)
    kh = k.reshape(N, H, hd)
    vh = v.reshape(N, H, hd)
    scores = (qh * kh).sum(-1) / np.sqrt(hd)                 # (N, H); key length == 1
    weights = jax.nn.softmax(scores[..., None], axis=-1)     # (N, H, 1) -> all ones
    ctx = (weights * vh).reshape(N, E)
    attn = ctx @ params["Wo"].T + params["bo"]
    x = query + attn
    mu = x.mean(-1, keepdims=True)
    var = ((x - mu) ** 2).mean(-1, keepdims=True)
    y = (x - mu) / jnp.sqrt(var + LN_EPS) * params["gamma"] + params["beta"]
    g = jax.nn.gelu(y, approximate=False)
    return g @ params["Wfc"].T + params["bfc"]


def init_params(key, embed_dim):
    ks = jax.random.split(key, 8)
    E = embed_dim
    in_proj_w = 0.05 * jax.random.normal(ks[0], (3 * E, E), jnp.float32)
    in_proj_b = 0.05 * jax.random.normal(ks[1], (3 * E,), jnp.float32)
    return {
        "Wq": in_proj_w[0 * E:1 * E], "bq": in_proj_b[0 * E:1 * E],
        "Wk": in_proj_w[1 * E:2 * E], "bk": in_proj_b[1 * E:2 * E],
        "Wv": in_proj_w[2 * E:3 * E], "bv": in_proj_b[2 * E:3 * E],
        "Wo": 0.05 * jax.random.normal(ks[2], (E, E), jnp.float32),
        "bo": 0.05 * jax.random.normal(ks[3], (E,), jnp.float32),
        "gamma": 1.0 + 0.05 * jax.random.normal(ks[4], (E,), jnp.float32),
        "beta": 0.05 * jax.random.normal(ks[5], (E,), jnp.float32),
        "Wfc": 0.05 * jax.random.normal(ks[6], (E, E), jnp.float32),
        "bfc": 0.05 * jax.random.normal(ks[7], (E,), jnp.float32),
    }


if __name__ == "__main__":
    root = jax.random.PRNGKey(0)
    k_q, k_k, k_v, k_p = jax.random.split(root, 4)

    query = jax.random.normal(k_q, (N_ROWS, EMBED_DIM), jnp.float32)
    key_in = jax.random.normal(k_k, (N_ROWS, EMBED_DIM), jnp.float32)
    value = jax.random.normal(k_v, (N_ROWS, EMBED_DIM), jnp.float32)
    params = init_params(k_p, EMBED_DIM)

    out = cross_attention_forward(query, key_in, value, params)
    out = jax.block_until_ready(out)

    ref = reference_forward(query, key_in, value, params)
    np.testing.assert_allclose(np.asarray(out), np.asarray(ref), rtol=1e-5, atol=1e-5)

    print("KERNEL_OK")
</pallas_src>

<mosaic_0001>
module attributes {stable_mosaic.version = 11 : i64} {
  func.func @cross_attention_kernel(%arg0: memref<16x32xf32, #tpu.memory_space<vmem>>, %arg1: memref<16x32xf32, #tpu.memory_space<vmem>>, %arg2: memref<72x32xf32, #tpu.memory_space<vmem>>, %arg3: memref<16x32xf32, #tpu.memory_space<vmem>>) attributes {dimension_semantics = [], scalar_prefetch = 0 : i64, scratch_operands = 0 : i64, tpu.core_type = #tpu.core_type<tc>} {
    %c0 = arith.constant 0 : index
    %c0_0 = arith.constant 0 : index
    %0 = vector.load %arg0[%c0, %c0_0] : memref<16x32xf32, #tpu.memory_space<vmem>>, vector<16x32xf32>
    %c0_1 = arith.constant 0 : index
    %c0_2 = arith.constant 0 : index
    %1 = vector.load %arg1[%c0_1, %c0_2] : memref<16x32xf32, #tpu.memory_space<vmem>>, vector<16x32xf32>
    %c0_3 = arith.constant 0 : index
    %c0_4 = arith.constant 0 : index
    %2 = vector.load %arg2[%c0_3, %c0_4] : memref<72x32xf32, #tpu.memory_space<vmem>>, vector<1x32xf32>
    %c1 = arith.constant 1 : index
    %c0_5 = arith.constant 0 : index
    %3 = vector.load %arg2[%c1, %c0_5] : memref<72x32xf32, #tpu.memory_space<vmem>>, vector<1x32xf32>
    %c2 = arith.constant 2 : index
    %c0_6 = arith.constant 0 : index
    %4 = vector.load %arg2[%c2, %c0_6] : memref<72x32xf32, #tpu.memory_space<vmem>>, vector<1x32xf32>
    %c3 = arith.constant 3 : index
    %c0_7 = arith.constant 0 : index
    %5 = vector.load %arg2[%c3, %c0_7] : memref<72x32xf32, #tpu.memory_space<vmem>>, vector<1x32xf32>
    %c8 = arith.constant 8 : index
    %c0_8 = arith.constant 0 : index
    %6 = vector.load %arg2[%c8, %c0_8] : memref<72x32xf32, #tpu.memory_space<vmem>>, vector<32x32xf32>
    %c40 = arith.constant 40 : index
    %c0_9 = arith.constant 0 : index
    %7 = vector.load %arg2[%c40, %c0_9] : memref<72x32xf32, #tpu.memory_space<vmem>>, vector<32x32xf32>
    %cst = arith.constant dense<0.000000e+00> : vector<16x32xf32>
    %8 = tpu.matmul %1, %6, %cst {dimension_numbers = #tpu.dot_dimension_numbers<[1], [0], [0], [1], [0, 0, 1, 1], [], []>} : vector<16x32xf32>, vector<32x32xf32>, vector<16x32xf32> -> vector<16x32xf32>
    %9 = vector.broadcast %2 : vector<1x32xf32> to vector<16x32xf32>
    %10 = arith.addf %8, %9 : vector<16x32xf32>
    %11 = arith.addf %0, %10 : vector<16x32xf32>
    %cst_10 = arith.constant dense<0.000000e+00> : vector<16xf32>
    %12 = vector.multi_reduction <add>, %11, %cst_10 [1] : vector<16x32xf32> to vector<16xf32>
    %13 = vector.shape_cast %12 : vector<16xf32> to vector<16x1xf32>
    %cst_11 = arith.constant 3.200000e+01 : f32
    %14 = vector.broadcast %cst_11 : f32 to vector<16x1xf32>
    %15 = arith.divf %13, %14 : vector<16x1xf32>
    %16 = vector.broadcast %15 : vector<16x1xf32> to vector<16x32xf32>
    %17 = arith.subf %11, %16 : vector<16x32xf32>
    %18 = vector.broadcast %15 : vector<16x1xf32> to vector<16x32xf32>
    %19 = arith.subf %11, %18 : vector<16x32xf32>
    %20 = arith.mulf %17, %19 : vector<16x32xf32>
    %cst_12 = arith.constant dense<0.000000e+00> : vector<16xf32>
    %21 = vector.multi_reduction <add>, %20, %cst_12 [1] : vector<16x32xf32> to vector<16xf32>
    %22 = vector.shape_cast %21 : vector<16xf32> to vector<16x1xf32>
    %cst_13 = arith.constant 3.200000e+01 : f32
    %23 = vector.broadcast %cst_13 : f32 to vector<16x1xf32>
    %24 = arith.divf %22, %23 : vector<16x1xf32>
    %25 = vector.broadcast %15 : vector<16x1xf32> to vector<16x32xf32>
    %26 = arith.subf %11, %25 : vector<16x32xf32>
    %cst_14 = arith.constant 9.99999974E-6 : f32
    %27 = vector.broadcast %cst_14 : f32 to vector<16x1xf32>
    %28 = arith.addf %24, %27 : vector<16x1xf32>
    %29 = math.rsqrt %28 : vector<16x1xf32>
    %30 = vector.broadcast %29 : vector<16x1xf32> to vector<16x32xf32>
    %31 = arith.mulf %26, %30 : vector<16x32xf32>
    %32 = vector.broadcast %3 : vector<1x32xf32> to vector<16x32xf32>
    %33 = arith.mulf %31, %32 : vector<16x32xf32>
    %34 = vector.broadcast %4 : vector<1x32xf32> to vector<16x32xf32>
    %35 = arith.addf %33, %34 : vector<16x32xf32>
    %cst_15 = arith.constant 5.000000e-01 : f32
    %36 = vector.broadcast %cst_15 : f32 to vector<16x32xf32>
    %37 = arith.mulf %36, %35 : vector<16x32xf32>
    %cst_16 = arith.constant 0.707106769 : f32
    %38 = vector.broadcast %cst_16 : f32 to vector<16x32xf32>
    %39 = arith.mulf %35, %38 : vector<16x32xf32>
    %40 = math.erf %39 : vector<16x32xf32>
    %cst_17 = arith.constant 1.000000e+00 : f32
    %41 = vector.broadcast %cst_17 : f32 to vector<16x32xf32>
    %42 = arith.addf %41, %40 : vector<16x32xf32>
    %43 = arith.mulf %37, %42 : vector<16x32xf32>
    %cst_18 = arith.constant dense<0.000000e+00> : vector<16x32xf32>
    %44 = tpu.matmul %43, %7, %cst_18 {dimension_numbers = #tpu.dot_dimension_numbers<[1], [0], [0], [1], [0, 0, 1, 1], [], []>} : vector<16x32xf32>, vector<32x32xf32>, vector<16x32xf32> -> vector<16x32xf32>
    %45 = vector.broadcast %5 : vector<1x32xf32> to vector<16x32xf32>
    %46 = arith.addf %44, %45 : vector<16x32xf32>
    %c0_19 = arith.constant 0 : index
    %c0_20 = arith.constant 0 : index
    %47 = vector.load %arg3[%c0_19, %c0_20] : memref<16x32xf32, #tpu.memory_space<vmem>>, vector<16x32xf32>
    tpu.vector_store %arg3[%c0_19, %c0_20], %46 {strides = array<i32>} : memref<16x32xf32, #tpu.memory_space<vmem>>, vector<16x32xf32>,
    return
  }
}

</mosaic_0001>

<bundles_post_ra>
// kernel: tpu_custom_call.1
= control target key start
LH: loop header
LB: loop body
LE: loop exit
PB: predicated region body
PF: predicated region fallthrough
CT: control target
= control target key end

     0   :  { %vm35_vm0 = vcmask 261120   ;;  %s430_s0 = inlined_call_operand.vmem [shape: f32[16,32], index: 0, kind: input, shape index: {}]   ;;  %s431_s1 = inlined_call_operand.vmem [shape: f32[16,32], index: 1, kind: input, shape index: {}]   ;;  %s432_s2 = inlined_call_operand.vmem [shape: f32[72,32], index: 2, kind: input, shape index: {}]   ;;  %s433_s3 = inlined_call_operand.hbm [shape: f32[16,32], index: 3, kind: output, shape index: {}]  }
   0x1   :  { %v26_v0 = vld [vmem:[%s432_s2 + $0x20] sm:$0xff]  ;;  %v25_v1 = vld [vmem:[%s432_s2 + $0x18] sm:$0xff]  ;;  %v24_v3 = vld [vmem:[%s432_s2 + $0x10] sm:$0xff] }
   0x2   :  { %291 = vmatprep.subr.mxu0 %v26_v0  ;;  %v17_v2 = vld [vmem:[%s431_s1] sm:$0xff] }
   0x3   :  { %292 = vmatpush3.msra.mxu0 %v26_v0  ;;  %299 = vmatprep.mubr.msk.f32.mxu0 %vm35_vm0, %v17_v2 }
   0x4   :  { %8 = vsyncpa [#allocation3], 0  ;;  %293 = vmatprep.subr.mxu0 %v25_v1  ;;  %v23_v4 = vld [vmem:[%s432_s2 + $0x8] sm:$0xff]  ;;  %v271_v7 = vld [vmem:[%s432_s2] ss:$0 sm:$0xff]  ;;  %s346_s15 = smov [#allocation2]  }
   0x5   :  { %294 = vmatpush3.msra.mxu0 %v25_v1  ;;  %v18_v5 = vld [vmem:[%s431_s1 + $0x8] sm:$0xff]  ;;  %v15_v9 = vld [vmem:[%s430_s0] sm:$0xff]  ;;  %v29_v28 = vld [vmem:[%s432_s2 + $0x38] sm:$0xff]  ;;  %s260_s16 = sshll.u32 %s346_s15, 4  ;;  %s261_s16 = int_to_ptr.vmem [resolvable:$true] %s260_s16 }
   0x6   :  { %295 = vmatprep.subr.mxu0 %v24_v3  ;;  %v16_v12 = vld [vmem:[%s430_s0 + $0x8] sm:$0xff]  ;;  %v30_v27 = vld [vmem:[%s432_s2 + $0x40] sm:$0xff]  ;;  %v28_v29 = vld [vmem:[%s432_s2 + $0x30] sm:$0xff]  ;;  %s324_s17 = scalar_lea.vmem %s261_s16, 256  ;;  %p329_p1 = scmp.lt.s32.totalorder %s261_s16, %s261_s16 }
   0x7   :  { %296 = vmatpush3.msra.mxu0 %v24_v3  ;;  %302 = vmatprep.subr.mxu1 %v30_v27  ;;  %v27_v30 = vld [vmem:[%s432_s2 + $0x28] sm:$0xff]  ;;  %v274_v38 = vld [vmem:[%s432_s2 + $0x1] ss:$0 sm:$0xff]  ;;  %v275_v40 = vld [vmem:[%s432_s2 + $0x2] ss:$0 sm:$0xff]  ;;  %p325_p0 = scmp.ne.s32.totalorder %s261_s16, %s324_s17  ;;  %p330_p2 = scmp.lt.s32.totalorder %s324_s17, %s324_s17 }
   0x8   :  { %297 = vmatprep.subr.mxu0 %v23_v4  ;;  %303 = vmatpush3.msra.mxu1 %v30_v27  ;;  %v276_v57 = vld [vmem:[%s432_s2 + $0x3] ss:$0 sm:$0xff] }
   0x9   :  { %298 = vmatpush3.msra.mxu0 %v23_v4  ;;  %304 = vmatprep.subr.mxu1 %v29_v28  ;;  %p331_p3 = por %p330_p2, %p329_p1 }
   0xa   :  { %300 = vmatmul.mubr.msk.f32.vlgmr.msra.gmra.mxu0 %vm35_vm0, %v18_v5  ;;  %305 = vmatpush3.msra.mxu1 %v29_v28 }
   0xb   :  { %306 = vmatprep.subr.mxu1 %v28_v29  ;;  %p332_p4 = pnand %p331_p3, %p325_p0 }
   0xc   :  { %307 = vmatpush3.msra.mxu1 %v28_v29 }
   0xd   :  { %308 = vmatprep.subr.mxu1 %v27_v30 }
   0xe   :  { %309 = vmatpush3.msra.mxu1 %v27_v30 }
  0xca   :  { %v301_v6 = vpop.f32.mrf.mxu0 }
  0xcb   :  { %v114_v10 = vadd.f32 %v301_v6, %v271_v7 }
  0xcc   :  { %v108_v8 = vpop.f32.mrf.mxu0 }
  0xcd   :  { %v109_v11 = vadd.f32 %v271_v7, %v108_v8  ;;  %v118_v15 = vadd.f32 %v114_v10, %v16_v12 }
  0xcf   :  { %v117_v13 = vadd.f32 %v109_v11, %v15_v9  ;;  %v122_v16 = vsel %vm35_vm0, %v118_v15, 0.0 }
  0xd1   :  { %v119_v14 = vsel %vm35_vm0, %v117_v13, 0.0 }
  0xd2   :  { %120 = vadd.xlane.f32.xlu0 %v119_v14 }
  0xd6   :  { %123 = vadd.xlane.f32.xlu0 %v122_v16 }
 0x15b   :  { %v121_v17 = vpop.xlane.xlu0 %120 }
 0x15c   :  { %v126_v18 = vmul.f32 0.03125, %v121_v17 }
 0x15e   :  { %v128_v19 = vsub.f32 %v117_v13, %v126_v18 }
 0x15f   :  { %v124_v20 = vpop.xlane.xlu0 %123 }
 0x160   :  { %v127_v21 = vmul.f32 0.03125, %v124_v20  ;;  %v130_v22 = vmul.f32 %v128_v19, %v128_v19 }
 0x162   :  { %v129_v23 = vsub.f32 %v118_v15, %v127_v21  ;;  %v132_v24 = vsel %vm35_vm0, %v130_v22, 0.0 }
 0x163   :  { %133 = vadd.xlane.f32.xlu1 %v132_v24 }
 0x164   :  { %v131_v25 = vmul.f32 %v129_v23, %v129_v23 }
 0x166   :  { %v135_v26 = vsel %vm35_vm0, %v131_v25, 0.0 }
 0x167   :  { %136 = vadd.xlane.f32.xlu1 %v135_v26 }
 0x1ec   :  { %v134_v31 = vpop.xlane.xlu1 %133 }
 0x1ed   :  { %v138_v32 = vmul.f32 0.03125, %v134_v31 }
 0x1ef   :  { %v140_v33 = vadd.f32 1e-05, %v138_v32 }
 0x1f0   :  { %v137_v34 = vpop.xlane.xlu1 %136 }
 0x1f1   :  { %316 = vrsqrt.f32 %v140_v33  ;;  %v139_v35 = vmul.f32 0.03125, %v137_v34 }
 0x1f3   :  { %v141_v36 = vadd.f32 1e-05, %v139_v35 }
 0x1f5   :  { %318 = vrsqrt.f32 %v141_v36 }
 0x1fe   :  { %v317_v37 = vpop.eup %316 }
 0x1ff   :  { %v144_v39 = vmul.f32 %v317_v37, %v128_v19 }
 0x201   :  { %v150_v41 = vmul.f32 %v274_v38, %v144_v39 }
 0x202   :  { %v319_v42 = vpop.eup %318 }
 0x203   :  { %v145_v43 = vmul.f32 %v319_v42, %v129_v23  ;;  %v156_v44 = vadd.f32 %v275_v40, %v150_v41 }
 0x205   :  { %v151_v45 = vmul.f32 %v274_v38, %v145_v43  ;;  %v160_v46 = vmul.f32 0.70710677, %v156_v44  ;;  %v158_v50 = vmul.f32 0.5, %v156_v44 }
 0x207   :  { %v157_v47 = vadd.f32 %v275_v40, %v151_v45  ;;  %320 = verf.f32 %v160_v46 }
 0x209   :  { %v161_v48 = vmul.f32 0.70710677, %v157_v47  ;;  %v159_v54 = vmul.f32 0.5, %v157_v47 }
 0x20b   :  { %322 = verf.f32 %v161_v48 }
 0x214   :  { %v321_v49 = vpop.eup %320 }
 0x215   :  { %v164_v51 = vadd.f32 1.0, %v321_v49 }
 0x217   :  { %v166_v52 = vmul.f32 %v164_v51, %v158_v50 }
 0x218   :  { %v323_v53 = vpop.eup %322 }
 0x219   :  { %310 = vmatprep.mubr.msk.f32.mxu1 %vm35_vm0, %v166_v52  ;;  %v165_v55 = vadd.f32 1.0, %v323_v53 }
 0x21b   :  { %v167_v56 = vmul.f32 %v165_v55, %v159_v54 }
 0x21d   :  { %311 = vmatmul.mubr.msk.f32.vlgmr.msra.gmra.mxu1 %vm35_vm0, %v167_v56 }
 0x2dd   :  { %v312_v58 = vpop.f32.mrf.mxu1 }
 0x2de   :  { %v250_v59 = vadd.f32 %v312_v58, %v276_v57 }
 0x2df   :  { %v244_v60 = vpop.f32.mrf.mxu1 }
 0x2e0   :  { %254 = vst.msk [vmem:[#allocation2 + $0x8] sm:$0xff] %vm35_vm0, %v250_v59  ;;  %v245_v61 = vadd.f32 %v276_v57, %v244_v60 }
 0x2e2   :  { %253 = vst.msk [vmem:[#allocation2] sm:$0xff] %vm35_vm0, %v245_v61 }
 0x2e3   :  { %335 = shalt.err (!%p332_p4)
}
 0x2e4   :  { %s347_s18 = smov 128   ;;  %s348_s2 = smov 8  }
 0x2e5   :  { %266 = dma.vmem_to_hbm [thread:$0]  %s261_s16, 256, %s433_s3, [#allocation3], %s347_s18, %s347_s18, %s348_s2  }
 0x2e6   :  { %344 = dma.done.wait [#allocation3], 256  }
 0x2e7   :  { %345 = vsyncadd [#allocation3], 4294967040 }
 0x2e8   :  { %270 = vsyncpa [#allocation3], 1 }

</bundles_post_ra>
